<compile_context>
chip_gen: v7x
topology: tpu7x:2x2x1
jax: 0.10.0
libtpu: 0.0.40
codegen_flags: <defaults>
</compile_context>

<pallas_src>
import functools
import math

import jax
import jax.numpy as jnp
from jax import lax
from jax.experimental import pallas as pl
from jax.experimental.pallas import tpu as pltpu

_NEG_BIG = -1e30


def _hybrid_margin_kernel(labc_ref, labr_ref, emb_ref, w_ref, invwn_ref, cenb_ref,
                          out_ref,
                          emb_n_ref, emb_nw_ref, m_ref, l_ref, tgt_ref, *,
                          num_classes, sub_centers, tile_classes, ragged,
                          arc_margin, arc_scale, triplet_margin, center_weight):
    ci = pl.program_id(0)
    n_tiles = pl.num_programs(0)
    B, D = emb_ref.shape
    K = sub_centers
    TN = tile_classes
    cos_m = math.cos(arc_margin)
    sin_m = math.sin(arc_margin)

    # ---- one-time init: normalize embeddings (f32 + weight-dtype copy), zero LSE state
    @pl.when(ci == 0)
    def _init():
        emb = emb_ref[...].astype(jnp.float32)
        inv = lax.rsqrt(jnp.maximum(jnp.sum(emb * emb, axis=1, keepdims=True), 1e-24))
        emb_n = emb * inv                                  # F.normalize(p=2, dim=1)
        emb_n_ref[...] = emb_n
        emb_nw_ref[...] = emb_n.astype(emb_nw_ref.dtype)   # cached MXU operand
        m_ref[...] = jnp.full((B, 1), _NEG_BIG, jnp.float32)
        l_ref[...] = jnp.zeros((B, 1), jnp.float32)
        tgt_ref[...] = jnp.zeros((B, 1), jnp.float32)

    emb_w = emb_nw_ref[...]                                # (B, D), weight dtype
    lab_col = labc_ref[...]                                # (B, 1) int32

    # classes covered by this tile; padded ids (>= C) can never equal a real label.
    class_ids = ci * TN + lax.broadcasted_iota(jnp.int32, (1, TN), 1)   # (1, TN)
    onehot = lab_col == class_ids                          # (B, TN)

    # ---- SubCenter ArcFace: K independent dots, post-matmul column normalization
    #      via the precomputed inverse norms, max over sub-centers ----
    cos_ks = [
        jnp.dot(emb_w, w_ref[k], preferred_element_type=jnp.float32) * invwn_ref[k]
        for k in range(K)
    ]
    cos_c = functools.reduce(jnp.maximum, cos_ks)          # (B, TN)

    # target-class cosine for rows whose label falls in this tile
    cos_t = jnp.sum(jnp.where(onehot, cos_c, 0.0), axis=1, keepdims=True)   # (B, 1)
    has_t = jnp.any(onehot, axis=1, keepdims=True)
    cos_t = jnp.clip(cos_t, -1.0 + 1e-7, 1.0 - 1e-7)
    sin_t = jnp.sqrt(jnp.maximum(1.0 - cos_t * cos_t, 0.0))
    cos_tm = cos_t * cos_m - sin_t * sin_m                 # == cos(acos(cos_t) + m)

    logits = arc_scale * jnp.where(onehot, cos_tm, cos_c)  # (B, TN)
    if ragged:  # static: single extra where, only when C % TN != 0
        logits = jnp.where(class_ids < num_classes, logits, _NEG_BIG)
    tgt_ref[...] += jnp.where(has_t, arc_scale * cos_tm, 0.0)

    # online log-sum-exp update
    m_prev = m_ref[...]
    m_new = jnp.maximum(m_prev, jnp.max(logits, axis=1, keepdims=True))
    l_ref[...] = (l_ref[...] * jnp.exp(m_prev - m_new)
                  + jnp.sum(jnp.exp(logits - m_new), axis=1, keepdims=True))
    m_ref[...] = m_new

    # ---- finalize: CE mean, batch-hard triplet, center loss ----
    @pl.when(ci == n_tiles - 1)
    def _finalize():
        lse = m_ref[...] + jnp.log(l_ref[...])                              # (B, 1)
        loss_arc = jnp.sum(lse - tgt_ref[...], keepdims=True) / B           # (1, 1)

        # batch-hard mining on normalized embeddings: ||a-b||^2 = 2 - 2*cos
        emb_nn = emb_n_ref[...]
        gram = jnp.dot(emb_nn, emb_nn.T, preferred_element_type=jnp.float32)  # (B, B)
        d2 = jnp.maximum(2.0 - 2.0 * gram, 0.0)
        lab_row = labr_ref[...]                                             # (1, B)
        same = lab_col == lab_row
        eye = (lax.broadcasted_iota(jnp.int32, (B, B), 0)
               == lax.broadcasted_iota(jnp.int32, (B, B), 1))
        pos_mask = jnp.logical_and(same, jnp.logical_not(eye))
        neg_mask = jnp.logical_not(same)
        has_pos = jnp.any(pos_mask, axis=1, keepdims=True)                  # (B, 1)
        d2_ap = jnp.max(jnp.where(pos_mask, d2, 0.0), axis=1, keepdims=True)
        d2_an = jnp.min(jnp.where(neg_mask, d2, 3e38), axis=1, keepdims=True)
        viol = jnp.maximum(jnp.sqrt(d2_ap) - jnp.sqrt(d2_an) + triplet_margin, 0.0)
        viol = jnp.where(has_pos, viol, 0.0)     # BatchHardMiner: drop anchors w/o positive
        nz = (viol > 0.0).astype(jnp.float32)
        denom = jnp.maximum(jnp.sum(nz, keepdims=True), 1.0)                # AvgNonZero
        loss_trip = jnp.sum(viol, keepdims=True) / denom                    # (1, 1)

        # center loss: MSE(normalized embeddings, centers[labels]), mean over B*D
        cen_b = cenb_ref[...].astype(jnp.float32)                           # (B, D)
        diff = emb_nn - cen_b
        loss_cen = jnp.sum(diff * diff, keepdims=True) / (B * D)            # (1, 1)

        out_ref[...] = loss_arc + loss_trip + center_weight * loss_cen


def _vmem_capacity_bytes():
    try:
        return int(pltpu.get_tpu_info().vmem_capacity_bytes)
    except Exception:
        return 64 * 1024 * 1024          # conservative (v7x-sized) fallback


def _choose_class_tile(C, D, K, w_isz, emb_isz, cen_isz, B, n_buffers, budget_bytes,
                       max_tile=2048):
    """Largest lane-aligned class tile whose n-buffered weight slab fits the budget."""
    per_col = n_buffers * K * (D * w_isz + 4)             # weight + inv-norm per class col
    fixed = (2 * B * D * emb_isz                          # embeddings input buffers
             + 2 * B * D * cen_isz                        # gathered centers buffers
             + B * D * (4 + w_isz)                        # emb_n / emb_nw scratch
             + (1 << 20))                                 # labels, accumulators, slack
    avail = budget_bytes - fixed
    if avail >= C * per_col:
        return C                                          # whole class axis resident
    tn = max(min(int(avail // per_col), max_tile) // 128 * 128, 128)
    for cand in range(tn, 127, -128):                     # prefer TN | C: no ragged tail
        if C % cand == 0:
            return cand
    return tn


def hybrid_margin_loss(embeddings, labels, arcface_w, centers, *,
                       subcenter_margin=0.4, subcenter_scale=30.0,
                       triplet_margin=0.3, center_loss_weight=0.01,
                       inv_col_norms=None, class_tile=None, weight_buffers=2):
    """Fused HybridMarginLoss forward.

    arcface_w: SubCenter-ArcFace weight kept persistently in (K, D, C) layout
      (sub_centers, embedding_size, num_classes) -> no per-call re-layout / transpose.
      bf16 weights are supported directly (matmuls accumulate in f32).
    inv_col_norms: optional precomputed (K, 1, C) f32 inverse column L2 norms of
      arcface_w (pass it to skip the cheap recomputation here).
    """
    B, D = embeddings.shape
    K, Dw, C = arcface_w.shape
    assert Dw == D and centers.shape == (C, D)

    lab_i32 = labels.astype(jnp.int32)
    lab_col = lab_i32.reshape(B, 1)
    lab_row = lab_i32.reshape(1, B)

    if inv_col_norms is None:    # tiny (K, 1, C); ideally cached next to the parameter
        wsq = jnp.square(arcface_w.astype(jnp.float32))
        inv_col_norms = lax.rsqrt(jnp.maximum(jnp.sum(wsq, axis=1, keepdims=True), 1e-24))

    # gather only the B center rows actually needed (instead of streaming (C, D)).
    centers_b = centers[lab_i32]

    # class tile + VMEM limit derived from device VMEM, K, D and the weight dtype.
    vmem_cap = _vmem_capacity_bytes()
    w_isz = jnp.dtype(arcface_w.dtype).itemsize
    if class_tile is None:
        TN = _choose_class_tile(C, D, K, w_isz, jnp.dtype(embeddings.dtype).itemsize,
                                jnp.dtype(centers.dtype).itemsize, B,
                                n_buffers=weight_buffers,
                                budget_bytes=int(vmem_cap * 0.55))
    else:
        TN = min(class_tile, C)
    n_tiles = pl.cdiv(C, TN)
    ragged = (C % TN) != 0
    need = TN * weight_buffers * K * (D * w_isz + 4) + B * D * (16 + 2 * w_isz) + (2 << 20)
    vmem_limit = int(min(max(need + (4 << 20), 32 * 1024 * 1024), vmem_cap * 0.92))

    w_spec_kwargs = {}
    if weight_buffers != 2:          # e.g. 3-deep buffering to hide DMA ramp on v7x
        w_spec_kwargs["pipeline_mode"] = pl.Buffered(weight_buffers)

    kernel = functools.partial(
        _hybrid_margin_kernel,
        num_classes=C, sub_centers=K, tile_classes=TN, ragged=ragged,
        arc_margin=float(subcenter_margin), arc_scale=float(subcenter_scale),
        triplet_margin=float(triplet_margin), center_weight=float(center_loss_weight))

    out = pl.pallas_call(
        kernel,
        out_shape=jax.ShapeDtypeStruct((1, 1), jnp.float32),
        grid_spec=pltpu.PrefetchScalarGridSpec(
            num_scalar_prefetch=0,
            grid=(n_tiles,),
            in_specs=[
                pl.BlockSpec((B, 1), lambda c: (0, 0)),            # labels (column)
                pl.BlockSpec((1, B), lambda c: (0, 0)),            # labels (row)
                pl.BlockSpec((B, D), lambda c: (0, 0)),            # embeddings
                pl.BlockSpec((K, D, TN), lambda c: (0, 0, c),      # weight class tile
                             **w_spec_kwargs),
                pl.BlockSpec((K, 1, TN), lambda c: (0, 0, c)),     # inv column norms
                pl.BlockSpec((B, D), lambda c: (0, 0)),            # gathered centers
            ],
            out_specs=pl.BlockSpec((1, 1), lambda c: (0, 0)),
            scratch_shapes=[
                pltpu.VMEM((B, D), jnp.float32),       # normalized embeddings (f32)
                pltpu.VMEM((B, D), arcface_w.dtype),   # normalized embeddings (w dtype)
                pltpu.VMEM((B, 1), jnp.float32),       # running max (online LSE)
                pltpu.VMEM((B, 1), jnp.float32),       # running sum-exp
                pltpu.VMEM((B, 1), jnp.float32),       # target-logit accumulator
            ]),
        compiler_params=pltpu.CompilerParams(
            dimension_semantics=("arbitrary",),        # class axis is a reduction
            vmem_limit_bytes=vmem_limit),
    )(lab_col, lab_row, embeddings, arcface_w, inv_col_norms, centers_b)
    return out[0, 0]


if __name__ == "__main__":
    B, D, C, K = 8, 32, 4, 3   # batch, embedding_size, num_classes, sub_centers
    key = jax.random.PRNGKey(0)
    k_emb, k_w, k_cen = jax.random.split(key, 3)

    embeddings = jax.random.normal(k_emb, (B, D), dtype=jnp.float32)
    # every label appears twice so each anchor has a hard positive and negative
    labels = jnp.array([0, 0, 1, 1, 2, 2, 3, 3], dtype=jnp.int32)
    # ArcFace sub-center weight stored persistently in (K, D, C) layout; bf16 works too.
    arcface_w = jax.random.normal(k_w, (K, D, C), dtype=jnp.float32)
    centers = jax.random.normal(k_cen, (C, D), dtype=jnp.float32)     # center-loss centers

    loss_fn = jax.jit(hybrid_margin_loss)
    loss = loss_fn(embeddings, labels, arcface_w, centers)
    jax.block_until_ready(loss)
    assert loss.shape == () and bool(jnp.isfinite(loss))
    print("KERNEL_OK")
</pallas_src>

<mosaic_0001>
module attributes {stable_mosaic.version = 11 : i64} {
  func.func @_hybrid_margin_kernel(%arg0: i32, %arg1: memref<8x1xi32, #tpu.memory_space<vmem>>, %arg2: memref<1x8xi32, #tpu.memory_space<vmem>>, %arg3: memref<8x32xf32, #tpu.memory_space<vmem>>, %arg4: memref<3x32x4xf32, #tpu.memory_space<vmem>>, %arg5: memref<3x1x4xf32, #tpu.memory_space<vmem>>, %arg6: memref<8x32xf32, #tpu.memory_space<vmem>>, %arg7: memref<1x1xf32, #tpu.memory_space<vmem>>, %arg8: memref<8x32xf32, #tpu.memory_space<vmem>>, %arg9: memref<8x32xf32, #tpu.memory_space<vmem>>, %arg10: memref<8x1xf32, #tpu.memory_space<vmem>>, %arg11: memref<8x1xf32, #tpu.memory_space<vmem>>, %arg12: memref<8x1xf32, #tpu.memory_space<vmem>>) attributes {dimension_semantics = [#tpu.dimension_semantics<arbitrary>], iteration_bounds = array<i64: 1>, scalar_prefetch = 0 : i64, scratch_operands = 5 : i64, tpu.core_type = #tpu.core_type<tc>, window_params = [{pipeline_mode = #tpu.pipeline_mode<synchronous>, transform_indices = @transform_0, window_bounds = array<i64: 8, 1>}, {pipeline_mode = #tpu.pipeline_mode<synchronous>, transform_indices = @transform_1, window_bounds = array<i64: 1, 8>}, {pipeline_mode = #tpu.pipeline_mode<synchronous>, transform_indices = @transform_2, window_bounds = array<i64: 8, 32>}, {transform_indices = @transform_3, window_bounds = array<i64: 3, 32, 4>}, {transform_indices = @transform_4, window_bounds = array<i64: 3, 1, 4>}, {pipeline_mode = #tpu.pipeline_mode<synchronous>, transform_indices = @transform_5, window_bounds = array<i64: 8, 32>}, {pipeline_mode = #tpu.pipeline_mode<synchronous>, transform_indices = @transform_6, window_bounds = array<i64: 1, 1>}]} {
    %c0_i32 = arith.constant 0 : i32
    %0 = arith.cmpi eq, %arg0, %c0_i32 : i32
    %1 = arith.extui %0 : i1 to i32
    %c0_i32_0 = arith.constant 0 : i32
    %2 = arith.cmpi ne, %1, %c0_i32_0 : i32
    scf.if %2 {
      %c0_53 = arith.constant 0 : index
      %c0_54 = arith.constant 0 : index
      %92 = vector.load %arg3[%c0_53, %c0_54] : memref<8x32xf32, #tpu.memory_space<vmem>>, vector<8x32xf32>
      %93 = arith.mulf %92, %92 : vector<8x32xf32>
      %cst_55 = arith.constant dense<0.000000e+00> : vector<8xf32>
      %94 = vector.multi_reduction <add>, %93, %cst_55 [1] : vector<8x32xf32> to vector<8xf32>
      %95 = vector.shape_cast %94 : vector<8xf32> to vector<8x1xf32>
      %cst_56 = arith.constant 1.000000e-24 : f32
      %96 = vector.broadcast %cst_56 : f32 to vector<8x1xf32>
      %97 = arith.maximumf %95, %96 : vector<8x1xf32>
      %98 = math.rsqrt %97 : vector<8x1xf32>
      %99 = vector.broadcast %98 : vector<8x1xf32> to vector<8x32xf32>
      %100 = arith.mulf %92, %99 : vector<8x32xf32>
      %c0_57 = arith.constant 0 : index
      %c0_58 = arith.constant 0 : index
      %101 = vector.load %arg8[%c0_57, %c0_58] : memref<8x32xf32, #tpu.memory_space<vmem>>, vector<8x32xf32>
      tpu.vector_store %arg8[%c0_57, %c0_58], %100 {strides = array<i32>} : memref<8x32xf32, #tpu.memory_space<vmem>>, vector<8x32xf32>,
      %c0_59 = arith.constant 0 : index
      %c0_60 = arith.constant 0 : index
      %102 = vector.load %arg9[%c0_59, %c0_60] : memref<8x32xf32, #tpu.memory_space<vmem>>, vector<8x32xf32>
      tpu.vector_store %arg9[%c0_59, %c0_60], %100 {strides = array<i32>} : memref<8x32xf32, #tpu.memory_space<vmem>>, vector<8x32xf32>,
      %cst_61 = arith.constant -1.000000e+30 : f32
      %103 = vector.broadcast %cst_61 : f32 to vector<8x1xf32>
      %c0_62 = arith.constant 0 : index
      %c0_63 = arith.constant 0 : index
      %104 = vector.load %arg10[%c0_62, %c0_63] : memref<8x1xf32, #tpu.memory_space<vmem>>, vector<8x1xf32>
      tpu.vector_store %arg10[%c0_62, %c0_63], %103 {strides = array<i32>} : memref<8x1xf32, #tpu.memory_space<vmem>>, vector<8x1xf32>,
      %cst_64 = arith.constant 0.000000e+00 : f32
      %105 = vector.broadcast %cst_64 : f32 to vector<8x1xf32>
      %c0_65 = arith.constant 0 : index
      %c0_66 = arith.constant 0 : index
      %106 = vector.load %arg11[%c0_65, %c0_66] : memref<8x1xf32, #tpu.memory_space<vmem>>, vector<8x1xf32>
      tpu.vector_store %arg11[%c0_65, %c0_66], %105 {strides = array<i32>} : memref<8x1xf32, #tpu.memory_space<vmem>>, vector<8x1xf32>,
      %cst_67 = arith.constant 0.000000e+00 : f32
      %107 = vector.broadcast %cst_67 : f32 to vector<8x1xf32>
      %c0_68 = arith.constant 0 : index
      %c0_69 = arith.constant 0 : index
      %108 = vector.load %arg12[%c0_68, %c0_69] : memref<8x1xf32, #tpu.memory_space<vmem>>, vector<8x1xf32>
      tpu.vector_store %arg12[%c0_68, %c0_69], %107 {strides = array<i32>} : memref<8x1xf32, #tpu.memory_space<vmem>>, vector<8x1xf32>,
    } else {
    }
    %c0 = arith.constant 0 : index
    %c0_1 = arith.constant 0 : index
    %3 = vector.load %arg9[%c0, %c0_1] : memref<8x32xf32, #tpu.memory_space<vmem>>, vector<8x32xf32>
    %c0_2 = arith.constant 0 : index
    %c0_3 = arith.constant 0 : index
    %4 = vector.load %arg1[%c0_2, %c0_3] : memref<8x1xi32, #tpu.memory_space<vmem>>, vector<8x1xi32>
    %c4_i32 = arith.constant 4 : i32
    %5 = arith.muli %arg0, %c4_i32 : i32
    %6 = tpu.iota {dimensions = array<i32: 1>} : vector<1x4xi32>
    %7 = vector.broadcast %5 : i32 to vector<1x4xi32>
    %8 = arith.addi %7, %6 : vector<1x4xi32>
    %9 = vector.broadcast %4 : vector<8x1xi32> to vector<8x4xi32>
    %10 = vector.broadcast %8 : vector<1x4xi32> to vector<8x4xi32>
    %11 = arith.cmpi eq, %9, %10 : vector<8x4xi32>
    %c0_4 = arith.constant 0 : index
    %c0_5 = arith.constant 0 : index
    %c0_6 = arith.constant 0 : index
    %12 = vector.load %arg4[%c0_4, %c0_5, %c0_6] : memref<3x32x4xf32, #tpu.memory_space<vmem>>, vector<1x32x4xf32>
    %13 = vector.shape_cast %12 : vector<1x32x4xf32> to vector<32x4xf32>
    %cst = arith.constant dense<0.000000e+00> : vector<8x4xf32>
    %14 = tpu.matmul %3, %13, %cst {dimension_numbers = #tpu.dot_dimension_numbers<[1], [0], [0], [1], [0, 0, 1, 1], [], []>} : vector<8x32xf32>, vector<32x4xf32>, vector<8x4xf32> -> vector<8x4xf32>
    %c0_7 = arith.constant 0 : index
    %c0_8 = arith.constant 0 : index
    %c0_9 = arith.constant 0 : index
    %15 = vector.load %arg5[%c0_7, %c0_8, %c0_9] : memref<3x1x4xf32, #tpu.memory_space<vmem>>, vector<1x1x4xf32>
    %16 = vector.shape_cast %15 : vector<1x1x4xf32> to vector<1x4xf32>
    %17 = vector.broadcast %16 : vector<1x4xf32> to vector<8x4xf32>
    %18 = arith.mulf %14, %17 : vector<8x4xf32>
    %c1 = arith.constant 1 : index
    %c0_10 = arith.constant 0 : index
    %c0_11 = arith.constant 0 : index
    %19 = vector.load %arg4[%c1, %c0_10, %c0_11] : memref<3x32x4xf32, #tpu.memory_space<vmem>>, vector<1x32x4xf32>
    %20 = vector.shape_cast %19 : vector<1x32x4xf32> to vector<32x4xf32>
    %cst_12 = arith.constant dense<0.000000e+00> : vector<8x4xf32>
    %21 = tpu.matmul %3, %20, %cst_12 {dimension_numbers = #tpu.dot_dimension_numbers<[1], [0], [0], [1], [0, 0, 1, 1], [], []>} : vector<8x32xf32>, vector<32x4xf32>, vector<8x4xf32> -> vector<8x4xf32>
    %c1_13 = arith.constant 1 : index
    %c0_14 = arith.constant 0 : index
    %c0_15 = arith.constant 0 : index
    %22 = vector.load %arg5[%c1_13, %c0_14, %c0_15] : memref<3x1x4xf32, #tpu.memory_space<vmem>>, vector<1x1x4xf32>
    %23 = vector.shape_cast %22 : vector<1x1x4xf32> to vector<1x4xf32>
    %24 = vector.broadcast %23 : vector<1x4xf32> to vector<8x4xf32>
    %25 = arith.mulf %21, %24 : vector<8x4xf32>
    %c2 = arith.constant 2 : index
    %c0_16 = arith.constant 0 : index
    %c0_17 = arith.constant 0 : index
    %26 = vector.load %arg4[%c2, %c0_16, %c0_17] : memref<3x32x4xf32, #tpu.memory_space<vmem>>, vector<1x32x4xf32>
    %27 = vector.shape_cast %26 : vector<1x32x4xf32> to vector<32x4xf32>
    %cst_18 = arith.constant dense<0.000000e+00> : vector<8x4xf32>
    %28 = tpu.matmul %3, %27, %cst_18 {dimension_numbers = #tpu.dot_dimension_numbers<[1], [0], [0], [1], [0, 0, 1, 1], [], []>} : vector<8x32xf32>, vector<32x4xf32>, vector<8x4xf32> -> vector<8x4xf32>
    %c2_19 = arith.constant 2 : index
    %c0_20 = arith.constant 0 : index
    %c0_21 = arith.constant 0 : index
    %29 = vector.load %arg5[%c2_19, %c0_20, %c0_21] : memref<3x1x4xf32, #tpu.memory_space<vmem>>, vector<1x1x4xf32>
    %30 = vector.shape_cast %29 : vector<1x1x4xf32> to vector<1x4xf32>
    %31 = vector.broadcast %30 : vector<1x4xf32> to vector<8x4xf32>
    %32 = arith.mulf %28, %31 : vector<8x4xf32>
    %33 = arith.maximumf %18, %25 : vector<8x4xf32>
    %34 = arith.maximumf %33, %32 : vector<8x4xf32>
    %cst_22 = arith.constant 0.000000e+00 : f32
    %35 = vector.broadcast %cst_22 : f32 to vector<8x4xf32>
    %36 = arith.select %11, %34, %35 : vector<8x4xi1>, vector<8x4xf32>
    %cst_23 = arith.constant dense<0.000000e+00> : vector<8xf32>
    %37 = vector.multi_reduction <add>, %36, %cst_23 [1] : vector<8x4xf32> to vector<8xf32>
    %38 = vector.shape_cast %37 : vector<8xf32> to vector<8x1xf32>
    %cst_24 = arith.constant 1.000000e+00 : f32
    %cst_25 = arith.constant 0.000000e+00 : f32
    %39 = vector.broadcast %cst_24 : f32 to vector<8x4xf32>
    %40 = vector.broadcast %cst_25 : f32 to vector<8x4xf32>
    %41 = arith.select %11, %39, %40 : vector<8x4xi1>, vector<8x4xf32>
    %cst_26 = arith.constant dense<0xFF800000> : vector<8xf32>
    %42 = vector.multi_reduction <maximumf>, %41, %cst_26 [1] : vector<8x4xf32> to vector<8xf32>
    %cst_27 = arith.constant 0.000000e+00 : f32
    %43 = vector.broadcast %cst_27 : f32 to vector<8xf32>
    %44 = arith.cmpf ogt, %42, %43 : vector<8xf32>
    %45 = vector.shape_cast %44 : vector<8xi1> to vector<8x1xi1>
    %cst_28 = arith.constant -0.99999988 : f32
    %cst_29 = arith.constant 0.99999988 : f32
    %46 = vector.broadcast %cst_28 : f32 to vector<8x1xf32>
    %47 = arith.maximumf %46, %38 : vector<8x1xf32>
    %48 = vector.broadcast %cst_29 : f32 to vector<8x1xf32>
    %49 = arith.minimumf %48, %47 : vector<8x1xf32>
    %50 = arith.mulf %49, %49 : vector<8x1xf32>
    %cst_30 = arith.constant 1.000000e+00 : f32
    %51 = vector.broadcast %cst_30 : f32 to vector<8x1xf32>
    %52 = arith.subf %51, %50 : vector<8x1xf32>
    %cst_31 = arith.constant 0.000000e+00 : f32
    %53 = vector.broadcast %cst_31 : f32 to vector<8x1xf32>
    %54 = arith.maximumf %52, %53 : vector<8x1xf32>
    %55 = math.sqrt %54 : vector<8x1xf32>
    %cst_32 = arith.constant 0.921060979 : f32
    %56 = vector.broadcast %cst_32 : f32 to vector<8x1xf32>
    %57 = arith.mulf %49, %56 : vector<8x1xf32>
    %cst_33 = arith.constant 0.389418334 : f32
    %58 = vector.broadcast %cst_33 : f32 to vector<8x1xf32>
    %59 = arith.mulf %55, %58 : vector<8x1xf32>
    %60 = arith.subf %57, %59 : vector<8x1xf32>
    %61 = vector.shape_cast %60 : vector<8x1xf32> to vector<8x1xf32>
    %62 = vector.broadcast %61 : vector<8x1xf32> to vector<8x4xf32>
    %63 = arith.select %11, %62, %34 : vector<8x4xi1>, vector<8x4xf32>
    %cst_34 = arith.constant 3.000000e+01 : f32
    %64 = vector.broadcast %cst_34 : f32 to vector<8x4xf32>
    %65 = arith.mulf %64, %63 : vector<8x4xf32>
    %c0_35 = arith.constant 0 : index
    %c0_36 = arith.constant 0 : index
    %66 = vector.load %arg12[%c0_35, %c0_36] : memref<8x1xf32, #tpu.memory_space<vmem>>, vector<8x1xf32>
    %cst_37 = arith.constant 3.000000e+01 : f32
    %67 = vector.broadcast %cst_37 : f32 to vector<8x1xf32>
    %68 = arith.mulf %67, %60 : vector<8x1xf32>
    %cst_38 = arith.constant 0.000000e+00 : f32
    %69 = vector.broadcast %cst_38 : f32 to vector<8x1xf32>
    %70 = arith.select %45, %68, %69 : vector<8x1xi1>, vector<8x1xf32>
    %71 = arith.addf %66, %70 : vector<8x1xf32>
    %c0_39 = arith.constant 0 : index
    %c0_40 = arith.constant 0 : index
    %72 = vector.load %arg12[%c0_39, %c0_40] : memref<8x1xf32, #tpu.memory_space<vmem>>, vector<8x1xf32>
    tpu.vector_store %arg12[%c0_39, %c0_40], %71 {strides = array<i32>} : memref<8x1xf32, #tpu.memory_space<vmem>>, vector<8x1xf32>,
    %c0_41 = arith.constant 0 : index
    %c0_42 = arith.constant 0 : index
    %73 = vector.load %arg10[%c0_41, %c0_42] : memref<8x1xf32, #tpu.memory_space<vmem>>, vector<8x1xf32>
    %cst_43 = arith.constant dense<0xFF800000> : vector<8xf32>
    %74 = vector.multi_reduction <maximumf>, %65, %cst_43 [1] : vector<8x4xf32> to vector<8xf32>
    %75 = vector.shape_cast %74 : vector<8xf32> to vector<8x1xf32>
    %76 = arith.maximumf %73, %75 : vector<8x1xf32>
    %c0_44 = arith.constant 0 : index
    %c0_45 = arith.constant 0 : index
    %77 = vector.load %arg11[%c0_44, %c0_45] : memref<8x1xf32, #tpu.memory_space<vmem>>, vector<8x1xf32>
    %78 = arith.subf %73, %76 : vector<8x1xf32>
    %79 = math.exp %78 : vector<8x1xf32>
    %80 = arith.mulf %77, %79 : vector<8x1xf32>
    %81 = vector.broadcast %76 : vector<8x1xf32> to vector<8x4xf32>
    %82 = arith.subf %65, %81 : vector<8x4xf32>
    %83 = math.exp %82 : vector<8x4xf32>
    %cst_46 = arith.constant dense<0.000000e+00> : vector<8xf32>
    %84 = vector.multi_reduction <add>, %83, %cst_46 [1] : vector<8x4xf32> to vector<8xf32>
    %85 = vector.shape_cast %84 : vector<8xf32> to vector<8x1xf32>
    %86 = arith.addf %80, %85 : vector<8x1xf32>
    %c0_47 = arith.constant 0 : index
    %c0_48 = arith.constant 0 : index
    %87 = vector.load %arg11[%c0_47, %c0_48] : memref<8x1xf32, #tpu.memory_space<vmem>>, vector<8x1xf32>
    tpu.vector_store %arg11[%c0_47, %c0_48], %86 {strides = array<i32>} : memref<8x1xf32, #tpu.memory_space<vmem>>, vector<8x1xf32>,
    %c0_49 = arith.constant 0 : index
    %c0_50 = arith.constant 0 : index
    %88 = vector.load %arg10[%c0_49, %c0_50] : memref<8x1xf32, #tpu.memory_space<vmem>>, vector<8x1xf32>
    tpu.vector_store %arg10[%c0_49, %c0_50], %76 {strides = array<i32>} : memref<8x1xf32, #tpu.memory_space<vmem>>, vector<8x1xf32>,
    %c0_i32_51 = arith.constant 0 : i32
    %89 = arith.cmpi eq, %arg0, %c0_i32_51 : i32
    %90 = arith.extui %89 : i1 to i32
    %c0_i32_52 = arith.constant 0 : i32
    %91 = arith.cmpi ne, %90, %c0_i32_52 : i32
    scf.if %91 {
      %c0_53 = arith.constant 0 : index
      %c0_54 = arith.constant 0 : index
      %92 = vector.load %arg10[%c0_53, %c0_54] : memref<8x1xf32, #tpu.memory_space<vmem>>, vector<8x1xf32>
      %c0_55 = arith.constant 0 : index
      %c0_56 = arith.constant 0 : index
      %93 = vector.load %arg11[%c0_55, %c0_56] : memref<8x1xf32, #tpu.memory_space<vmem>>, vector<8x1xf32>
      %94 = math.log %93 : vector<8x1xf32>
      %95 = arith.addf %92, %94 : vector<8x1xf32>
      %c0_57 = arith.constant 0 : index
      %c0_58 = arith.constant 0 : index
      %96 = vector.load %arg12[%c0_57, %c0_58] : memref<8x1xf32, #tpu.memory_space<vmem>>, vector<8x1xf32>
      %97 = arith.subf %95, %96 : vector<8x1xf32>
      %98 = vector.shape_cast %97 : vector<8x1xf32> to vector<1x8x1xf32>
      %cst_59 = arith.constant dense<0.000000e+00> : vector<1xf32>
      %99 = vector.multi_reduction <add>, %98, %cst_59 [1, 2] : vector<1x8x1xf32> to vector<1xf32>
      %100 = vector.shape_cast %99 : vector<1xf32> to vector<1x1x1xf32>
      %101 = vector.extract %100[0, 0, 0] : f32 from vector<1x1x1xf32>
      %102 = vector.broadcast %101 : f32 to vector<1x1xf32>
      %cst_60 = arith.constant 8.000000e+00 : f32
      %103 = vector.broadcast %cst_60 : f32 to vector<1x1xf32>
      %104 = arith.divf %102, %103 : vector<1x1xf32>
      %c0_61 = arith.constant 0 : index
      %c0_62 = arith.constant 0 : index
      %105 = vector.load %arg8[%c0_61, %c0_62] : memref<8x32xf32, #tpu.memory_space<vmem>>, vector<8x32xf32>
      %106 = tpu.transpose %105, [1, 0] : vector<8x32xf32> -> vector<32x8xf32>
      %cst_63 = arith.constant dense<0.000000e+00> : vector<8x8xf32>
      %107 = tpu.matmul %105, %106, %cst_63 {dimension_numbers = #tpu.dot_dimension_numbers<[1], [0], [0], [1], [0, 0, 1, 1], [], []>} : vector<8x32xf32>, vector<32x8xf32>, vector<8x8xf32> -> vector<8x8xf32>
      %cst_64 = arith.constant 2.000000e+00 : f32
      %108 = vector.broadcast %cst_64 : f32 to vector<8x8xf32>
      %109 = arith.mulf %108, %107 : vector<8x8xf32>
      %cst_65 = arith.constant 2.000000e+00 : f32
      %110 = vector.broadcast %cst_65 : f32 to vector<8x8xf32>
      %111 = arith.subf %110, %109 : vector<8x8xf32>
      %cst_66 = arith.constant 0.000000e+00 : f32
      %112 = vector.broadcast %cst_66 : f32 to vector<8x8xf32>
      %113 = arith.maximumf %111, %112 : vector<8x8xf32>
      %c0_67 = arith.constant 0 : index
      %c0_68 = arith.constant 0 : index
      %114 = vector.load %arg2[%c0_67, %c0_68] : memref<1x8xi32, #tpu.memory_space<vmem>>, vector<1x8xi32>
      %115 = vector.broadcast %4 : vector<8x1xi32> to vector<8x8xi32>
      %116 = vector.broadcast %114 : vector<1x8xi32> to vector<8x8xi32>
      %117 = arith.cmpi eq, %115, %116 : vector<8x8xi32>
      %118 = tpu.iota {dimensions = array<i32: 0>} : vector<8x8xi32>
      %119 = tpu.iota {dimensions = array<i32: 1>} : vector<8x8xi32>
      %120 = arith.cmpi eq, %118, %119 : vector<8x8xi32>
      %cst_69 = arith.constant dense<true> : vector<8x8xi1>
      %121 = arith.xori %120, %cst_69 : vector<8x8xi1>
      %122 = arith.andi %117, %121 : vector<8x8xi1>
      %cst_70 = arith.constant dense<true> : vector<8x8xi1>
      %123 = arith.xori %117, %cst_70 : vector<8x8xi1>
      %cst_71 = arith.constant 1.000000e+00 : f32
      %cst_72 = arith.constant 0.000000e+00 : f32
      %124 = vector.broadcast %cst_71 : f32 to vector<8x8xf32>
      %125 = vector.broadcast %cst_72 : f32 to vector<8x8xf32>
      %126 = arith.select %122, %124, %125 : vector<8x8xi1>, vector<8x8xf32>
      %cst_73 = arith.constant dense<0xFF800000> : vector<8xf32>
      %127 = vector.multi_reduction <maximumf>, %126, %cst_73 [1] : vector<8x8xf32> to vector<8xf32>
      %cst_74 = arith.constant 0.000000e+00 : f32
      %128 = vector.broadcast %cst_74 : f32 to vector<8xf32>
      %129 = arith.cmpf ogt, %127, %128 : vector<8xf32>
      %130 = vector.shape_cast %129 : vector<8xi1> to vector<8x1xi1>
      %cst_75 = arith.constant 0.000000e+00 : f32
      %131 = vector.broadcast %cst_75 : f32 to vector<8x8xf32>
      %132 = arith.select %122, %113, %131 : vector<8x8xi1>, vector<8x8xf32>
      %cst_76 = arith.constant dense<0xFF800000> : vector<8xf32>
      %133 = vector.multi_reduction <maximumf>, %132, %cst_76 [1] : vector<8x8xf32> to vector<8xf32>
      %134 = vector.shape_cast %133 : vector<8xf32> to vector<8x1xf32>
      %cst_77 = arith.constant 3.000000e+38 : f32
      %135 = vector.broadcast %cst_77 : f32 to vector<8x8xf32>
      %136 = arith.select %123, %113, %135 : vector<8x8xi1>, vector<8x8xf32>
      %cst_78 = arith.constant dense<0x7F800000> : vector<8xf32>
      %137 = vector.multi_reduction <minimumf>, %136, %cst_78 [1] : vector<8x8xf32> to vector<8xf32>
      %138 = vector.shape_cast %137 : vector<8xf32> to vector<8x1xf32>
      %139 = math.sqrt %134 : vector<8x1xf32>
      %140 = math.sqrt %138 : vector<8x1xf32>
      %141 = arith.subf %139, %140 : vector<8x1xf32>
      %cst_79 = arith.constant 3.000000e-01 : f32
      %142 = vector.broadcast %cst_79 : f32 to vector<8x1xf32>
      %143 = arith.addf %141, %142 : vector<8x1xf32>
      %cst_80 = arith.constant 0.000000e+00 : f32
      %144 = vector.broadcast %cst_80 : f32 to vector<8x1xf32>
      %145 = arith.maximumf %143, %144 : vector<8x1xf32>
      %cst_81 = arith.constant 0.000000e+00 : f32
      %146 = vector.broadcast %cst_81 : f32 to vector<8x1xf32>
      %147 = arith.select %130, %145, %146 : vector<8x1xi1>, vector<8x1xf32>
      %cst_82 = arith.constant 0.000000e+00 : f32
      %148 = vector.broadcast %cst_82 : f32 to vector<8x1xf32>
      %149 = arith.cmpf ogt, %147, %148 : vector<8x1xf32>
      %150 = arith.extui %149 : vector<8x1xi1> to vector<8x1xi32>
      %151 = arith.sitofp %150 : vector<8x1xi32> to vector<8x1xf32>
      %152 = vector.shape_cast %151 : vector<8x1xf32> to vector<1x8x1xf32>
      %cst_83 = arith.constant dense<0.000000e+00> : vector<1xf32>
      %153 = vector.multi_reduction <add>, %152, %cst_83 [1, 2] : vector<1x8x1xf32> to vector<1xf32>
      %154 = vector.shape_cast %153 : vector<1xf32> to vector<1x1x1xf32>
      %155 = vector.extract %154[0, 0, 0] : f32 from vector<1x1x1xf32>
      %156 = vector.broadcast %155 : f32 to vector<1x1xf32>
      %cst_84 = arith.constant 1.000000e+00 : f32
      %157 = vector.broadcast %cst_84 : f32 to vector<1x1xf32>
      %158 = arith.maximumf %156, %157 : vector<1x1xf32>
      %159 = vector.shape_cast %147 : vector<8x1xf32> to vector<1x8x1xf32>
      %cst_85 = arith.constant dense<0.000000e+00> : vector<1xf32>
      %160 = vector.multi_reduction <add>, %159, %cst_85 [1, 2] : vector<1x8x1xf32> to vector<1xf32>
      %161 = vector.shape_cast %160 : vector<1xf32> to vector<1x1x1xf32>
      %162 = vector.extract %161[0, 0, 0] : f32 from vector<1x1x1xf32>
      %163 = vector.broadcast %162 : f32 to vector<1x1xf32>
      %164 = arith.divf %163, %158 : vector<1x1xf32>
      %c0_86 = arith.constant 0 : index
      %c0_87 = arith.constant 0 : index
      %165 = vector.load %arg6[%c0_86, %c0_87] : memref<8x32xf32, #tpu.memory_space<vmem>>, vector<8x32xf32>
      %166 = arith.subf %105, %165 : vector<8x32xf32>
      %167 = arith.mulf %166, %166 : vector<8x32xf32>
      %168 = vector.shape_cast %167 : vector<8x32xf32> to vector<1x8x32xf32>
      %cst_88 = arith.constant dense<0.000000e+00> : vector<1xf32>
      %169 = vector.multi_reduction <add>, %168, %cst_88 [1, 2] : vector<1x8x32xf32> to vector<1xf32>
      %170 = vector.shape_cast %169 : vector<1xf32> to vector<1x1x1xf32>
      %171 = vector.extract %170[0, 0, 0] : f32 from vector<1x1x1xf32>
      %172 = vector.broadcast %171 : f32 to vector<1x1xf32>
      %cst_89 = arith.constant 2.560000e+02 : f32
      %173 = vector.broadcast %cst_89 : f32 to vector<1x1xf32>
      %174 = arith.divf %172, %173 : vector<1x1xf32>
      %175 = arith.addf %104, %164 : vector<1x1xf32>
      %cst_90 = arith.constant 0.00999999977 : f32
      %176 = vector.broadcast %cst_90 : f32 to vector<1x1xf32>
      %177 = arith.mulf %176, %174 : vector<1x1xf32>
      %178 = arith.addf %175, %177 : vector<1x1xf32>
      %c0_91 = arith.constant 0 : index
      %c0_92 = arith.constant 0 : index
      %179 = vector.load %arg7[%c0_91, %c0_92] : memref<1x1xf32, #tpu.memory_space<vmem>>, vector<1x1xf32>
      tpu.vector_store %arg7[%c0_91, %c0_92], %178 {strides = array<i32>} : memref<1x1xf32, #tpu.memory_space<vmem>>, vector<1x1xf32>,
    } else {
    }
    return
  }
  func.func @transform_0(%arg0: i32) -> (i32, i32) {
    %c0_i32 = arith.constant 0 : i32
    %c0_i32_0 = arith.constant 0 : i32
    %c0_i32_1 = arith.constant 0 : i32
    return %c0_i32, %c0_i32_0 : i32, i32
  }
  func.func @transform_1(%arg0: i32) -> (i32, i32) {
    %c0_i32 = arith.constant 0 : i32
    %c0_i32_0 = arith.constant 0 : i32
    %c0_i32_1 = arith.constant 0 : i32
    return %c0_i32, %c0_i32_0 : i32, i32
  }
  func.func @transform_2(%arg0: i32) -> (i32, i32) {
    %c0_i32 = arith.constant 0 : i32
    %c0_i32_0 = arith.constant 0 : i32
    %c0_i32_1 = arith.constant 0 : i32
    return %c0_i32, %c0_i32_0 : i32, i32
  }
  func.func @transform_3(%arg0: i32) -> (i32, i32, i32) {
    %c0_i32 = arith.constant 0 : i32
    %c0_i32_0 = arith.constant 0 : i32
    %c0_i32_1 = arith.constant 0 : i32
    return %c0_i32, %c0_i32_0, %arg0 : i32, i32, i32
  }
  func.func @transform_4(%arg0: i32) -> (i32, i32, i32) {
    %c0_i32 = arith.constant 0 : i32
    %c0_i32_0 = arith.constant 0 : i32
    %c0_i32_1 = arith.constant 0 : i32
    return %c0_i32, %c0_i32_0, %arg0 : i32, i32, i32
  }
  func.func @transform_5(%arg0: i32) -> (i32, i32) {
    %c0_i32 = arith.constant 0 : i32
    %c0_i32_0 = arith.constant 0 : i32
    %c0_i32_1 = arith.constant 0 : i32
    return %c0_i32, %c0_i32_0 : i32, i32
  }
  func.func @transform_6(%arg0: i32) -> (i32, i32) {
    %c0_i32 = arith.constant 0 : i32
    %c0_i32_0 = arith.constant 0 : i32
    %c0_i32_1 = arith.constant 0 : i32
    return %c0_i32, %c0_i32_0 : i32, i32
  }
}

</mosaic_0001>

<bundles_post_ra>
// kernel: hybrid_margin_loss.1
= control target key start
LH: loop header
LB: loop body
LE: loop exit
PB: predicated region body
PF: predicated region fallthrough
CT: control target
= control target key end

     0   :  { %vm30_vm0 = vcmask 261120   ;;  %s917_s0 = inlined_call_operand.vmem [shape: s32[8,1], index: 0, kind: input, shape index: {}]   ;;  %s918_s1 = inlined_call_operand.vmem [shape: s32[1,8], index: 1, kind: input, shape index: {}]   ;;  %s919_s2 = inlined_call_operand.vmem [shape: f32[8,32], index: 2, kind: input, shape index: {}]   ;;  %s920_s3 = inlined_call_operand.vmem [shape: f32[3,32,4], index: 3, kind: input, shape index: {}]   ;;  %s921_s4 = inlined_call_operand.vmem [shape: f32[3,1,4], index: 4, kind: input, shape index: {}]   ;;  %s922_s5 = inlined_call_operand.vmem [shape: f32[8,32], index: 5, kind: input, shape index: {}]   ;;  %s923_s6 = inlined_call_operand.hbm [shape: f32[1,1], index: 6, kind: output, shape index: {}]  }
   0x1   :  { %v28_v0 = vld [vmem:[%s919_s2] sm:$0xff] }
   0x2   :  { %11 = vsyncpa [#allocation8], 0  ;;  %v29_v1 = vmul.f32 %v28_v0, %v28_v0  ;;  %v576_v3 = vld [vmem:[%s920_s3 + $0x20] sm:$0xff]  ;;  %v577_v4 = vld [vmem:[%s920_s3 + $0x28] sm:$0xff]  ;;  %v725_v6 = vmov 0.0|0.0   ;;  %vm726_vm1 = vmmov 0   ;;  %v46_v34 = vlaneseq }
   0x3   :  { %v657_v5 = vpack.c.bf16 %v577_v4, %v576_v3  ;;  %656 = vmatprep.subr.bf16.mxu1 %v725_v6  ;;  %650 = vmatprep.subr.bf16.mxu0 %v725_v6  ;;  %v578_v7 = vld [vmem:[%s920_s3 + $0x30] sm:$0xff]  ;;  %v579_v8 = vld [vmem:[%s920_s3 + $0x38] sm:$0xff]  ;;  %v54_v10 = vld [vmem:[%s920_s3] sm:$0xff]  ;;  %v727_v16 = vmov 0.0   ;;  %v728_v18 = vmov 0   ;;  %vm729_vm3 = vmmov 1  }
   0x4   :  { %v31_v2 = vsel %vm30_vm0, %v29_v1, 0.0  ;;  %v660_v9 = vpack.c.bf16 %v579_v8, %v578_v7  ;;  %v55_v11 = vld [vmem:[%s920_s3 + $0x8] sm:$0xff]  ;;  %v56_v13 = vld [vmem:[%s920_s3 + $0x10] sm:$0xff]  ;;  %v57_v14 = vld [vmem:[%s920_s3 + $0x18] sm:$0xff]  ;;  %620 = vmatprep.mubr.msk.f32.mxu0 %vm726_vm1, %v727_v16  ;;  %631 = vmatprep.mubr.msk.f32.mxu1 %vm726_vm1, %v727_v16  ;;  %v849_v37 = vand.u32 127, %v46_v34  ;;  %v474_v38 = vshrl.u32 %v46_v34, 7 }
   0x5   :  { %32 = vadd.xlane.f32.xlu0 %v31_v2  ;;  %658 = vmatpush3.bf16.msra.mxu1 %v657_v5  ;;  %v651_v12 = vpack.c.bf16 %v55_v11, %v54_v10  ;;  %v654_v15 = vpack.c.bf16 %v57_v14, %v56_v13  ;;  %v44_v17 = vld [vmem:[%s917_s0] sm:$0xff]  ;;  %v584_v24 = vld [vmem:[%s920_s3 + $0x48] sm:$0xff]  ;;  %v585_v26 = vld [vmem:[%s920_s3 + $0x50] sm:$0xff]  ;;  %vm480_vm8 = vcmask 64512   ;;  %vm311_vm10 = vcmask 31744   ;;  %s731_s8 = smov [#allocation7]  }
   0x6   :  { %659 = vmatprep.subr.bf16.mxu1 %v725_v6  ;;  %683 = vset.pattern.permute.xlu0 %v728_v18  ;;  %v583_v23 = vld [vmem:[%s920_s3 + $0x40] sm:$0xff]  ;;  %v586_v27 = vld [vmem:[%s920_s3 + $0x58] sm:$0xff]  ;;  %vm475_vm5 = vcmp.eq.s32.totalorder %v474_v38, %v849_v37  ;;  %vm39_vm11 = vcmask 7168   ;;  %v730_v62 = vmov -1e+30   ;;  %s566_s9 = sshll.u32 %s731_s8, 4  ;;  %s567_s9 = int_to_ptr.vmem [resolvable:$true] %s566_s9 }
   0x7   :  { %652 = vmatpush3.bf16.msra.mxu0 %v651_v12  ;;  %684 = vset.pattern.permute.xlu1 %v728_v18  ;;  %v663_v25 = vpack.c.bf16 %v584_v24, %v583_v23  ;;  %v666_v30 = vpack.c.bf16 %v586_v27, %v585_v26  ;;  %v593_v31 = vld [vmem:[%s918_s1] ss:$0 sm:$0xff]  ;;  %v582_v36 = vld [vmem:[%s921_s4 + $0x1] ss:$0 sm:$0xff]  ;;  %vm476_vm6 = vmxor %vm475_vm5, %vm729_vm3  ;;  %40 = vst.msk [vmem:[#allocation4] sm:$0xff] %vm39_vm11, %v730_v62  ;;  %s701_s10 = scalar_lea.vmem %s567_s9, 16  ;;  %p706_p1 = scmp.lt.s32.totalorder %s567_s9, %s567_s9 }
   0x8   :  { %653 = vmatprep.subr.bf16.mxu0 %v725_v6  ;;  %v575_v35 = vld [vmem:[%s921_s4] ss:$0 sm:$0xff]  ;;  %v589_v49 = vld [vmem:[%s921_s4 + $0x2] ss:$0 sm:$0xff]  ;;  %41 = vst.msk [vmem:[#allocation5] sm:$0xff] %vm39_vm11, %v727_v16  ;;  %42 = vst.msk [vmem:[#allocation6] sm:$0xff] %vm39_vm11, %v727_v16  ;;  %p702_p0 = scmp.ne.s32.totalorder %s567_s9, %s701_s10 }
   0x9   :  { %661 = vmatpush3.bf16.msra.mxu1 %v660_v9  ;;  %s705_s11 = scalar_lea.vmem %s567_s9, 32 }
   0xa   :  { %645 = vmatprep.subr.mxu1 %v727_v16  ;;  %p707_p2 = scmp.lt.s32.totalorder %s705_s11, %s701_s10 }
   0xb   :  { %655 = vmatpush3.bf16.msra.mxu0 %v654_v15 }
   0xc   :  { %662 = vmatprep.subr.bf16.mxu0 %v725_v6  ;;  %p708_p3 = por %p707_p2, %p706_p1 }
   0xe   :  { %v343_v15 = vld [vmem:[#allocation4] sm:$0xff]  ;;  %p709_p4 = pnand %p708_p3, %p702_p0 }
  0x1b   :  { %51 = vperm.xlu0 %683, %v44_v17  }
  0x92   :  { %v33_v19 = vpop.xlane.xlu0 %32 }
  0x93   :  { %v34_v20 = vmax.f32 %v33_v19, 1e-24 }
  0x95   :  { %685 = vrsqrt.f32 %v34_v20 }
  0x9a   :  { %v833_v32 = vpop.permute.xlu0 %51 }
  0x9b   :  { %vm472_vm2 = vcmp.eq.s32.totalorder %v833_v32, %v593_v31  ;;  %vm53_vm9 = vcmp.eq.s32.totalorder %v833_v32, %v849_v37 }
  0x9c   :  { %vm839_vm4 = vmxor %vm472_vm2, %vm729_vm3  ;;  %v315_v26 = vsel %vm53_vm9, 1.0, %v727_v16 }
  0x9d   :  { %vm858_vm7 = vmand %vm472_vm2, %vm476_vm6  ;;  %v316_v27 = vsel %vm311_vm10, %v315_v26, -inf }
  0x9f   :  { %v686_v21 = vpop.eup %685 }
  0xa0   :  { %v36_v22 = vmul.f32 %v686_v21, %v28_v0 }
  0xa2   :  { %37 = vst.msk [vmem:[#allocation2] sm:$0xff] %vm30_vm0, %v36_v22  ;;  %38 = vst.msk [vmem:[#allocation3] sm:$0xff] %vm30_vm0, %v36_v22 }
  0xa9   :  { %v43_v28 = vld [vmem:[#allocation3] sm:$0xff]  ;;  %v817_v29 = vld [vmem:[#allocation2] sm:$0xff] }
  0xaa   :  { %621 = vmatmul.mubr.msk.f32.vlgmr.msra.gmra.mrb[0].mxu0 %vm30_vm0, %v43_v28  ;;  %632 = vmatmul.mubr.msk.f32.vlgmr.msra.gmra.mrb[0].mxu1 %vm30_vm0, %v43_v28 }
  0xab   :  { %664 = vmatpush3.bf16.msra.mxu0 %v663_v25  ;;  %646 = vmatpush3.xpose.msk.msra.mxu1 %vm30_vm0, %v817_v29 }
  0xac   :  { %665 = vmatprep.subr.bf16.mxu0 %v725_v6  ;;  %647 = vmatprep.mubr.msk.f32.mxu1 %vm726_vm1, %v727_v16 }
  0xad   :  { %642 = vmatprep.mubr.msk.f32.mxu0 %vm726_vm1, %v727_v16 }
  0xae   :  { %648 = vmatmul.mubr.msk.f32.vlgmr.msra.gmra.mrb[2].mxu1 %vm30_vm0, %v817_v29 }
  0xaf   :  { %667 = vmatpush3.bf16.msra.mxu0 %v666_v30 }
  0xb2   :  { %643 = vmatmul.mubr.msk.f32.vlgmr.msra.gmra.mrb[2].mxu0 %vm30_vm0, %v43_v28  ;;  %v479_v28 = vsel %vm858_vm7, 1.0, %v727_v16 }
  0xb3   :  { %v481_v30 = vsel %vm480_vm8, %v479_v28, -inf }
 0x17d   :  { %v128_v39 = vpop.f32.mrb[0].mxu0  ;;  %v211_v40 = vpop.f32.mrb[0].mxu1 }
 0x17e   :  { %v139_v41 = vmul.f32 %v575_v35, %v128_v39  ;;  %v223_v42 = vmul.f32 %v582_v36, %v211_v40  ;;  %v622_v43 = vpop.f32.mrb[1].mxu0  ;;  %v633_v44 = vpop.f32.mrb[1].mxu1  ;;  %v348_v35 = vld [vmem:[#allocation5] sm:$0xff]  ;;  %v337_v39 = vld [vmem:[#allocation6] sm:$0xff] }
 0x180   :  { %v308_v45 = vmax.f32 %v139_v41, %v223_v42 }
 0x181   :  { %v460_v46 = vpop.f32.mrb[2].mxu1 }
 0x182   :  { %v464_v47 = vmul.f32 2.0, %v460_v46  ;;  %v649_v48 = vpop.f32.mrb[3].mxu1 }
 0x184   :  { %v465_v50 = vsub.f32 2.0, %v464_v47 }
 0x185   :  { %v295_v51 = vpop.f32.mrb[2].mxu0 }
 0x186   :  { %v466_v53 = vmax.f32 %v465_v50, 0.0  ;;  %v307_v54 = vmul.f32 %v589_v49, %v295_v51  ;;  %v644_v55 = vpop.f32.mrb[3].mxu0 }
 0x188   :  { %v309_v56 = vmax.f32 %v308_v45, %v307_v54  ;;  %v485_v57 = vsel %vm858_vm7, %v466_v53, 0.0  ;;  %v489_v58 = vsel %vm839_vm4, %v466_v53, 3e+38 }
 0x189   :  { %v486_v59 = vsel %vm480_vm8, %v485_v57, -inf  ;;  %v490_v25 = vsel %vm480_vm8, %v489_v58, inf }
 0x18a   :  { %487 = vmax.xlane.f32.xlu0 %v486_v59  ;;  %v310_v60 = vsel %vm53_vm9, %v309_v56, 0.0 }
 0x18b   :  { %v312_v61 = vsel %vm311_vm10, %v310_v60, 0.0 }
 0x18c   :  { %313 = vadd.xlane.f32.xlu1 %v312_v61 }
 0x217   :  { %v488_v34 = vpop.xlane.xlu0 %487 }
 0x218   :  { %vm495_vm15 = vcmp.eq.f32.partialorder %v488_v34, inf  ;;  %v498_v50 = vand.u32 2147483648, %v488_v34  ;;  %vm497_vm2 = vcmp.eq.f32.partialorder %v488_v34, 0.0 }
 0x219   :  { %v314_v63 = vpop.xlane.xlu1 %313 }
 0x21a   :  { %v590_v0 = vclamps-f32 %v314_v63, 0.9999999 }
 0x21c   :  { %v322_v1 = vmul.f32 %v590_v0, %v590_v0  ;;  %v332_v9 = vmul.f32 0.921061, %v590_v0  ;;  %v539_v0 = vld [vmem:[%s922_s5] sm:$0xff] }
 0x21e   :  { %v323_v2 = vsub.f32 1.0, %v322_v1 }
 0x220   :  { %v324_v3 = vmax.f32 %v323_v2, 0.0 }
 0x222   :  { %687 = vrsqrt.f32 %v324_v3  ;;  %vm327_vm12 = vcmp.eq.f32.partialorder %v324_v3, inf  ;;  %v330_v6 = vand.u32 2147483648, %v324_v3  ;;  %vm329_vm13 = vcmp.eq.f32.partialorder %v324_v3, 0.0 }
 0x22c   :  { %v688_v4 = vpop.eup %687 }
 0x22d   :  { %v326_v5 = vmul.f32 %v688_v4, %v324_v3 }
 0x22f   :  { %v328_v7 = vsel %vm327_vm12, %v324_v3, %v326_v5  ;;  %v540_v5 = vsub.f32 %v817_v29, %v539_v0 }
 0x230   :  { %v331_v8 = vsel %vm329_vm13, %v330_v6, %v328_v7 }
 0x231   :  { %v333_v10 = vmul.f32 0.38941833, %v331_v8  ;;  %v541_v8 = vmul.f32 %v540_v5, %v540_v5 }
 0x233   :  { %v334_v11 = vsub.f32 %v332_v9, %v333_v10  ;;  %v542_v9 = vsel %vm30_vm0, %v541_v8, 0.0  ;;  %vm558_vm0 = vcmask 0  }
 0x235   :  { %v335_v12 = vsel %vm53_vm9, %v334_v11, %v309_v56  ;;  %v338_v40 = vmul.f32 30.0, %v334_v11 }
 0x236   :  { %v336_v13 = vmul.f32 30.0, %v335_v12 }
 0x238   :  { %v344_v14 = vsel %vm311_vm10, %v336_v13, -inf }
 0x239   :  { %345 = vmax.xlane.f32.xlu1 %v344_v14 }
 0x2c6   :  { %v346_v17 = vpop.xlane.xlu1 %345 }
 0x2c7   :  { %v347_v18 = vmax.f32 %v343_v15, %v346_v17 }
 0x2c9   :  { %v349_v19 = vsub.f32 %v343_v15, %v347_v18  ;;  %366 = vst.msk [vmem:[#allocation4] sm:$0xff] %vm39_vm11, %v347_v18  ;;  %355 = vperm.xlu1 %684, %v347_v18  }
 0x2cb   :  { %v350_v31 = vmul.f32 1.442695, %v349_v19 }
 0x2d0   :  { %v370_v60 = vld [vmem:[#allocation4] sm:$0xff] }
 0x348   :  { %v356_v20 = vpop.permute.xlu1 %355 }
 0x349   :  { %v358_v21 = vsub.f32 %v336_v13, %v356_v20 }
 0x34b   :  { %v359_v22 = vmul.f32 1.442695, %v358_v21 }
 0x34d   :  { %689 = vpow2.f32 %v359_v22 }
 0x34e   :  { %691 = vpow2.f32 %v350_v31 }
 0x34f   :  { %693 = vrsqrt.f32 %v488_v34 }
 0x357   :  { %v690_v23 = vpop.eup %689 }
 0x358   :  { %v361_v24 = vsel %vm311_vm10, %v690_v23, 0.0  ;;  %v692_v33 = vpop.eup %691 }
 0x359   :  { %362 = vadd.xlane.f32.xlu1 %v361_v24  ;;  %v352_v36 = vmul.f32 %v692_v33, %v348_v35  ;;  %v694_v42 = vpop.eup %693 }
 0x35a   :  { %v494_v46 = vmul.f32 %v694_v42, %v488_v34 }
 0x35c   :  { %v496_v49 = vsel %vm495_vm15, %v488_v34, %v494_v46 }
 0x35d   :  { %491 = vmin.xlane.f32.xlu1 %v490_v25  ;;  %v499_v53 = vsel %vm497_vm2, %v498_v50, %v496_v49 }
 0x361   :  { %317 = vmax.xlane.f32.xlu1 %v316_v27 }
 0x365   :  { %482 = vmax.xlane.f32.xlu1 %v481_v30 }
 0x3e6   :  { %v363_v38 = vpop.xlane.xlu1 %362 }
 0x3e7   :  { %v364_v32 = vadd.f32 %v363_v38, %v352_v36 }
 0x3e9   :  { %365 = vst.msk [vmem:[#allocation5] sm:$0xff] %vm39_vm11, %v364_v32 }
 0x3ea   :  { %v492_v37 = vpop.xlane.xlu1 %491 }
 0x3eb   :  { %695 = vrsqrt.f32 %v492_v37  ;;  %vm502_vm1 = vcmp.eq.f32.partialorder %v492_v37, inf  ;;  %v505_v51 = vand.u32 2147483648, %v492_v37  ;;  %vm504_vm3 = vcmp.eq.f32.partialorder %v492_v37, 0.0 }
 0x3ee   :  { %v318_v41 = vpop.xlane.xlu1 %317 }
 0x3ef   :  { %vm319_vm14 = vcmp.gt.f32.partialorder %v318_v41, 0.0 }
 0x3f0   :  { %v339_v43 = vsel %vm319_vm14, %v338_v40, 0.0  ;;  %v371_v44 = vld [vmem:[#allocation5] sm:$0xff] }
 0x3f1   :  { %v340_v45 = vadd.f32 %v339_v43, %v337_v39  ;;  %697 = vlog2.f32 %v371_v44 }
 0x3f2   :  { %v483_v57 = vpop.xlane.xlu1 %482 }
 0x3f3   :  { %342 = vst.msk [vmem:[#allocation6] sm:$0xff] %vm39_vm11, %v340_v45  ;;  %vm484_vm4 = vcmp.gt.f32.partialorder %v483_v57, 0.0 }
 0x3f5   :  { %v696_v47 = vpop.eup %695 }
 0x3f6   :  { %v501_v48 = vmul.f32 %v696_v47, %v492_v37 }
 0x3f8   :  { %v503_v52 = vsel %vm502_vm1, %v492_v37, %v501_v48 }
 0x3f9   :  { %v506_v54 = vsel %vm504_vm3, %v505_v51, %v503_v52 }
 0x3fa   :  { %v507_v55 = vsub.f32 %v499_v53, %v506_v54  ;;  %v375_v63 = vld [vmem:[#allocation6] sm:$0xff] }
 0x3fb   :  { %v698_v56 = vpop.eup %697 }
 0x3fc   :  { %v508_v58 = vadd.f32 0.3, %v507_v55  ;;  %v373_v59 = vmul.f32 0.6931472, %v698_v56 }
 0x3fe   :  { %v509_v61 = vmax.f32 %v508_v58, 0.0  ;;  %v374_v62 = vadd.f32 %v373_v59, %v370_v60 }
 0x400   :  { %v510_v1 = vsel %vm484_vm4, %v509_v61, 0.0  ;;  %v376_v2 = vsub.f32 %v374_v62, %v375_v63 }
 0x401   :  { %v526_v3 = vsel %vm39_vm11, %v510_v1, 0.0  ;;  %vm511_vm5 = vcmp.gt.f32.partialorder %v510_v1, 0.0 }
 0x402   :  { %527 = vadd.xlane.f32.xlu0 %v526_v3  ;;  %v377_v4 = vsel %vm39_vm11, %v376_v2, 0.0  ;;  %v594_v6 = vsel %vm511_vm5, 1.0, %v727_v16 }
 0x403   :  { %378 = vadd.xlane.f32.xlu1 %v377_v4  ;;  %v514_v7 = vsel %vm39_vm11, %v594_v6, 0.0 }
 0x407   :  { %515 = vadd.xlane.f32.xlu1 %v514_v7 }
 0x40b   :  { %543 = vadd.xlane.f32.xlu1 %v542_v9 }
 0x48f   :  { %v528_v10 = vpop.xlane.xlu0 %527 }
 0x490   :  { %v529_v11 = vrot.slane %v528_v10, 4  ;;  %v379_v12 = vpop.xlane.xlu1 %378 }
 0x491   :  { %v380_v13 = vrot.slane %v379_v12, 4 }
 0x492   :  { %v530_v14 = vadd.f32 %v529_v11, %v528_v10 }
 0x493   :  { %v381_v15 = vadd.f32 %v380_v13, %v379_v12 }
 0x494   :  { %v531_v17 = vrot.slane %v530_v14, 2  ;;  %v516_v18 = vpop.xlane.xlu1 %515 }
 0x495   :  { %v382_v19 = vrot.slane %v381_v15, 2  ;;  %v517_v29 = vrot.slane %v516_v18, 4 }
 0x496   :  { %v532_v16 = vadd.f32 %v531_v17, %v530_v14 }
 0x497   :  { %v518_v20 = vadd.f32 %v517_v29, %v516_v18  ;;  %v383_v21 = vadd.f32 %v382_v19, %v381_v15 }
 0x498   :  { %v544_v22 = vpop.xlane.xlu1 %543  ;;  %v533_v30 = vrot.slane %v532_v16, 1 }
 0x499   :  { %v519_v23 = vrot.slane %v518_v20, 2  ;;  %v545_v24 = vrot.slane %v544_v22, 4  ;;  %v384_v25 = vrot.slane %v383_v21, 1 }
 0x49a   :  { %v534_v36 = vadd.f32 %v533_v30, %v532_v16 }
 0x49b   :  { %v546_v26 = vadd.f32 %v545_v24, %v544_v22  ;;  %v385_v27 = vadd.f32 %v384_v25, %v383_v21  ;;  %v520_v28 = vadd.f32 %v519_v23, %v518_v20 }
 0x49d   :  { %v547_v31 = vrot.slane %v546_v26, 2  ;;  %668 = vpush %v385_v27  ;;  %v521_v33 = vrot.slane %v520_v28, 1 }
 0x49f   :  { %v548_v34 = vadd.f32 %v547_v31, %v546_v26  ;;  %v522_v35 = vadd.f32 %v521_v33, %v520_v28 }
 0x4a1   :  { %670 = vpush %v522_v35  ;;  %v549_v38 = vrot.slane %v548_v34, 1 }
 0x4a2   :  { %672 = vpush %v534_v36 }
 0x4a3   :  { %v550_v32 = vadd.f32 %v549_v38, %v548_v34 }
 0x4a5   :  { %674 = vpush %v550_v32 }
 0x4ce   :  { %s669_s5 = spop %668 }
 0x4cf   :  { %v387_v41 = vstv %s669_s5 }
 0x4d0   :  { %v389_v45 = vmul.f32 0.125, %v387_v41 }
 0x4d2   :  { %s671_s29 = spop %670 }
 0x4d3   :  { %v524_v37 = vstv %s671_s29  ;;  %s673_s30 = spop %672 }
 0x4d4   :  { %v525_v39 = vmax.f32 %v524_v37, 1.0  ;;  %v536_v44 = vstv %s673_s30 }
 0x4d6   :  { %699 = vrcp.f32 %v525_v39  ;;  %s675_s7 = spop %674 }
 0x4d7   :  { %v552_v40 = vstv %s675_s7 }
 0x4d8   :  { %v554_v42 = vmul.f32 0.00390625, %v552_v40 }
 0x4da   :  { %v556_v48 = vmul.f32 0.01, %v554_v42 }
 0x4e0   :  { %v700_v43 = vpop.eup %699 }
 0x4e1   :  { %v538_v46 = vmul.f32 %v700_v43, %v536_v44 }
 0x4e3   :  { %v555_v47 = vadd.f32 %v538_v46, %v389_v45 }
 0x4e5   :  { %v557_v49 = vadd.f32 %v556_v48, %v555_v47 }
 0x4e7   :  { %559 = vst.msk [vmem:[#allocation7] sm:$0x1] %vm558_vm0, %v557_v49 }
 0x4e8   :  { %712 = shalt.err (!%p709_p4)
}
 0x4e9   :  { %s713_s14 = scalar_lea.hbm %s923_s6, 16 }
 0x4ea   :  { %p714_p5 = scmp.ne.s32.totalorder %s923_s6, %s713_s14  ;;  %p717_p6 = scmp.lt.u32.totalorder %s713_s14, %s923_s6 }
 0x4ec   :  { %p719_p7 = pnand %p717_p6, %p714_p5 }
 0x4ee   :  { %722 = shalt.err (!%p719_p7)
}
 0x4ef   :  { %569 = dma.vmem_to_hbm [thread:$0]  %s567_s9, 16, %s923_s6, [#allocation8]  }
 0x4f0   :  { %723 = dma.done.wait [#allocation8], 16  }
 0x4f1   :  { %724 = vsyncadd [#allocation8], 4294967280 }
 0x4f2   :  { %573 = vsyncpa [#allocation8], 1 }

</bundles_post_ra>
